<compile_context>
chip_gen: v7x
topology: tpu7x:2x2x1
jax: 0.10.0
libtpu: 0.0.40
codegen_flags: <defaults>
</compile_context>

<pallas_src>
import functools

import jax
import jax.numpy as jnp
from jax import lax
from jax.experimental import pallas as pl
from jax.experimental.pallas import tpu as pltpu

NEG_SLOPE = 0.01            # every leaky_relu in AttentiveFP / GATEConv / GATConv
NEG_MASK = -1e30
HP = 128                    # hidden channels padded to one full lane group
EP = 16                     # edge_dim 14 padded to a sublane multiple
VMEM_LIMIT = 48 * 1024 * 1024

_VMEM = pltpu.MemorySpace.VMEM


# ----------------------------- in-kernel helpers ---------------------------- #

def _leaky(v):
    return jnp.where(v > 0, v, NEG_SLOPE * v)


def _elu(v):
    return jnp.where(v > 0, v, jnp.exp(jnp.minimum(v, 0.0)) - 1.0)


def _sigmoid(v):
    return 0.5 * (jnp.tanh(0.5 * v) + 1.0)


def _bf(v):
    return v.astype(jnp.bfloat16)


def _gru(h_in, h_prev, w_ih, w_hh, b_ih, b_hh):
    # torch.nn.GRUCell; gates packed [r|z|n] along the last (lane) axis.
    # bf16 MXU operands, f32 accumulation; elementwise math stays f32.
    hp = h_prev.shape[-1]
    gi = jnp.dot(_bf(h_in), w_ih, preferred_element_type=jnp.float32) + b_ih
    gh = jnp.dot(_bf(h_prev), w_hh, preferred_element_type=jnp.float32) + b_hh
    r = _sigmoid(gi[:, 0:hp] + gh[:, 0:hp])
    z = _sigmoid(gi[:, hp:2 * hp] + gh[:, hp:2 * hp])
    n = jnp.tanh(gi[:, 2 * hp:3 * hp] + r * gh[:, 2 * hp:3 * hp])
    return (1.0 - z) * n + z * h_prev


def _masked_softmax(scores, mask):
    # single select; masked exps underflow to exact 0.
    sc = jnp.where(mask > 0, scores, NEG_MASK)
    m = jnp.max(sc, axis=-1, keepdims=True)
    e = jnp.exp(sc - m)
    den = jnp.sum(e, axis=-1, keepdims=True)
    return e * pl.reciprocal(den, approx=True)


# ------------------------------- Pallas kernels ----------------------------- #
# ---- GATE layer: hoisted projection kernel (runs once per forward) ---- #

def gate_proj_kernel(x0_ref, wl1_ref, bl1_ref, w12_ref, xf_ref, xw12_ref):
    """x = leaky_relu(lin1(x0)); xw12 = x @ [W1x | W2]  (one 256-wide matmul)."""
    xf = _leaky(jnp.dot(x0_ref[...], wl1_ref[...],
                        preferred_element_type=jnp.float32) + bl1_ref[...])      # [Np,HP]
    xf_ref[...] = xf
    xw12_ref[...] = _bf(jnp.dot(_bf(xf), w12_ref[...],
                                preferred_element_type=jnp.float32))             # [Np,2HP]


# ---- GATE layer: tiled attention + GRU with fused edge embedding ---- #

def gate_attn_kernel(xf_t_ref, xw12_ref, adj_ref, ea_ref,
                     w1e_ref, attl_ref, attr_ref, bg_ref,
                     wih_ref, whh_ref, bih_ref, bhh_ref,
                     out_ref,
                     m_ref, l_ref, deg_ref, acc_ref):
    """GATEConv (edge embedding fused, online softmax over source chunks)
    + elu + GRUCell + relu.  Grid: (target tile i, source chunk c)."""
    c = pl.program_id(1)
    tm, hp = out_ref.shape
    nc = adj_ref.shape[1]

    @pl.when(c == 0)
    def _():
        m_ref[...] = jnp.full_like(m_ref, NEG_MASK)
        l_ref[...] = jnp.zeros_like(l_ref)
        deg_ref[...] = jnp.zeros_like(deg_ref)
        acc_ref[...] = jnp.zeros_like(acc_ref)

    adj = adj_ref[...]                                                           # [TM,NC]
    xw1_c = xw12_ref[:, 0:hp]                                                    # [NC,HP] bf16
    xw2_c = xw12_ref[:, hp:2 * hp]                                               # [NC,HP] bf16

    # Fused edge embedding for this (target tile, source chunk); never in HBM.
    ew = jnp.dot(ea_ref[...], w1e_ref[...],
                 preferred_element_type=jnp.float32)                             # [TM*NC,HP]
    z = _leaky(xw1_c.astype(jnp.float32)[None, :, :] + ew.reshape(tm, nc, hp))   # [TM,NC,HP]
    sj = jnp.sum(z * attl_ref[...], axis=-1)                                     # [TM,NC]
    si = jnp.sum(xf_t_ref[...] * attr_ref[...], axis=-1, keepdims=True)          # [TM,1]
    sc = jnp.where(adj > 0, _leaky(sj + si), NEG_MASK)

    # Online softmax carried across source chunks (flash-attention style).
    m_prev = m_ref[...]
    m_new = jnp.maximum(m_prev, jnp.max(sc, axis=-1, keepdims=True))
    a = jnp.exp(m_prev - m_new)
    p = jnp.exp(sc - m_new)
    l_ref[...] = a * l_ref[...] + jnp.sum(p, axis=-1, keepdims=True)
    acc_ref[...] = a * acc_ref[...] + jnp.dot(_bf(p), xw2_c,
                                              preferred_element_type=jnp.float32)
    deg_ref[...] = deg_ref[...] + jnp.sum(adj, axis=-1, keepdims=True)
    m_ref[...] = m_new

    @pl.when(c == pl.num_programs(1) - 1)
    def _():
        agg = acc_ref[...] * pl.reciprocal(l_ref[...], approx=True)
        h = _elu(jnp.where(deg_ref[...] > 0, agg, 0.0) + bg_ref[...])
        # TODO(synk): dropout on alpha / h is identity at inference (eval mode).
        out_ref[...] = jnp.maximum(
            _gru(h, xf_t_ref[...], wih_ref[...], whh_ref[...],
                 bih_ref[...], bhh_ref[...]), 0.0)


# ---- Atom GATConv layer: hoisted projection kernel ---- #

def atom_proj_kernel(x_ref, w_ref, asrc_ref, adst_ref,
                     g_ref, asrc_out_ref, adst_out_ref):
    """g = x @ W; per-node attention terms a_src (row) / a_dst (col)."""
    g = jnp.dot(_bf(x_ref[...]), w_ref[...],
                preferred_element_type=jnp.float32)                              # [Np,HP]
    g_ref[...] = _bf(g)
    asrc_out_ref[...] = jnp.dot(asrc_ref[...], g.T,
                                preferred_element_type=jnp.float32)              # [1,Np]
    adst_out_ref[...] = jnp.sum(g * adst_ref[...], axis=-1, keepdims=True)       # [Np,1]


# ---- Atom GATConv layer: tiled attention + GRU ---- #

def atom_attn_kernel(g_ref, asrc_ref, adst_ref, xt_ref, adj_ref,
                     b_ref, wih_ref, whh_ref, bih_ref, bhh_ref,
                     out_ref):
    """GATConv (heads=1, slope 0.01, no self loops) + elu + GRUCell + relu."""
    adj = adj_ref[...]                                                           # [TM,Np]
    alpha = _masked_softmax(_leaky(adst_ref[...] + asrc_ref[...]), adj)          # [TM,Np]
    agg = jnp.dot(_bf(alpha), g_ref[...],
                  preferred_element_type=jnp.float32)                            # [TM,HP]
    deg = jnp.sum(adj, axis=-1, keepdims=True)
    h = _elu(jnp.where(deg > 0, agg, 0.0) + b_ref[...])
    # TODO(synk): dropout is identity at inference.
    out_ref[...] = jnp.maximum(
        _gru(h, xt_ref[...], wih_ref[...], whh_ref[...], bih_ref[...],
             bhh_ref[...]), 0.0)


# ---- Molecule readout: pool + timesteps of mol attention + GRU + Linear ---- #

def mol_readout_kernel(x_ref, mask_ref,
                       wm_ref, asrc_ref, adst_ref, bm_ref,
                       wih_ref, whh_ref, bih_ref, bhh_ref,
                       w2_ref, b2_ref,
                       out_ref, *, num_timesteps):
    x = x_ref[...]                                                               # [Np,HP]
    mask = mask_ref[...]                                                         # [B,Np]

    out0 = jnp.maximum(jnp.dot(mask, x, preferred_element_type=jnp.float32), 0.0)  # [B,HP]

    # Source-side terms are timestep-invariant: hoisted out of the loop.
    g_src = jnp.dot(_bf(x), wm_ref[...], preferred_element_type=jnp.float32)     # [Np,HP]
    g_src_bf = _bf(g_src)
    a_src = jnp.dot(asrc_ref[...], g_src.T, preferred_element_type=jnp.float32)  # [1,Np]

    wm, adst, bm = wm_ref[...], adst_ref[...], bm_ref[...]
    wih, whh, bih, bhh = wih_ref[...], whh_ref[...], bih_ref[...], bhh_ref[...]

    def step(_, out):
        g_dst = jnp.dot(_bf(out), wm, preferred_element_type=jnp.float32)        # [B,HP]
        a_dst = jnp.sum(g_dst * adst, axis=-1, keepdims=True)                    # [B,1]
        alpha = _masked_softmax(_leaky(a_dst + a_src), mask)                     # [B,Np]
        h = _elu(jnp.dot(_bf(alpha), g_src_bf,
                         preferred_element_type=jnp.float32) + bm)               # [B,HP]
        # TODO(synk): dropout is identity at inference.
        return jnp.maximum(_gru(h, out, wih, whh, bih, bhh), 0.0)

    out = lax.fori_loop(0, num_timesteps, step, out0)
    out_ref[...] = jnp.dot(out, w2_ref[...],
                           preferred_element_type=jnp.float32) + b2_ref[...]


# --------------------------------- wrappers --------------------------------- #

def _grid_sizes(num_nodes):
    """Padded node count and tile sizes (Np, TM_gate, NC, TM_atom)."""
    if num_nodes <= 128:
        npad = ((num_nodes + 7) // 8) * 8
        return npad, npad, npad, npad
    npad = ((num_nodes + 127) // 128) * 128
    # TM_gate kept moderate: the [TM, NC, HP] f32 edge-embed intermediate is the
    # VMEM limiter (sized for v7x's 64 MiB as well as v5e/v6e's 128 MiB).
    return npad, 64, 128, 128


def gate_layer(x0, adj, ea3, p, npad, tm, nc):
    nt, ncs = npad // tm, npad // nc

    # (1) hoisted per-source projections: run once, not once per target tile.
    xf, xw12 = pl.pallas_call(
        gate_proj_kernel,
        out_shape=(jax.ShapeDtypeStruct((npad, HP), jnp.float32),
                   jax.ShapeDtypeStruct((npad, 2 * HP), jnp.bfloat16)),
        in_specs=[pl.BlockSpec(memory_space=_VMEM)] * 4,
        out_specs=(pl.BlockSpec(memory_space=_VMEM),
                   pl.BlockSpec(memory_space=_VMEM)),
        compiler_params=pltpu.CompilerParams(vmem_limit_bytes=VMEM_LIMIT),
    )(x0, p["w_lin1"], p["b_lin1"], p["w12"])

    # (2) retile ea to [nt, ncs, TM*NC, EP] so each grid step gets a contiguous
    #     2-D bf16 block (target-major rows within the block).
    ea_t = ea3.reshape(nt, tm, ncs, nc, EP).transpose(0, 2, 1, 3, 4)
    ea_t = ea_t.reshape(nt, ncs, tm * nc, EP)

    def c00(shape):
        return pl.BlockSpec(shape, lambda i, c: (0,) * len(shape))

    in_specs = [
        pl.BlockSpec((tm, HP), lambda i, c: (i, 0)),                 # xf target rows
        pl.BlockSpec((nc, 2 * HP), lambda i, c: (c, 0)),             # xw12 source chunk
        pl.BlockSpec((tm, nc), lambda i, c: (i, c)),                 # adj chunk
        pl.BlockSpec((None, None, tm * nc, EP),
                     lambda i, c: (i, c, 0, 0)),                     # ea tile (bf16)
        c00(p["w1e"].shape), c00(p["att_l"].shape), c00(p["att_r"].shape),
        c00(p["bias"].shape),
        c00(p["gru_w_ih"].shape), c00(p["gru_w_hh"].shape),
        c00(p["gru_b_ih"].shape), c00(p["gru_b_hh"].shape),
    ]
    return pl.pallas_call(
        gate_attn_kernel,
        out_shape=jax.ShapeDtypeStruct((npad, HP), jnp.float32),
        grid=(nt, ncs),
        in_specs=in_specs,
        out_specs=pl.BlockSpec((tm, HP), lambda i, c: (i, 0)),
        scratch_shapes=[pltpu.VMEM((tm, 1), jnp.float32),
                        pltpu.VMEM((tm, 1), jnp.float32),
                        pltpu.VMEM((tm, 1), jnp.float32),
                        pltpu.VMEM((tm, HP), jnp.float32)],
        compiler_params=pltpu.CompilerParams(
            dimension_semantics=("parallel", "arbitrary"),
            vmem_limit_bytes=VMEM_LIMIT),
    )(xf, xw12, adj, ea_t,
      p["w1e"], p["att_l"], p["att_r"], p["bias"],
      p["gru_w_ih"], p["gru_w_hh"], p["gru_b_ih"], p["gru_b_hh"])


def atom_layer(x, adj, p, npad, tm):
    # (1) hoisted per-node projection + attention terms (runs once).
    g, a_src, a_dst = pl.pallas_call(
        atom_proj_kernel,
        out_shape=(jax.ShapeDtypeStruct((npad, HP), jnp.bfloat16),
                   jax.ShapeDtypeStruct((1, npad), jnp.float32),
                   jax.ShapeDtypeStruct((npad, 1), jnp.float32)),
        in_specs=[pl.BlockSpec(memory_space=_VMEM)] * 4,
        out_specs=(pl.BlockSpec(memory_space=_VMEM),
                   pl.BlockSpec(memory_space=_VMEM),
                   pl.BlockSpec(memory_space=_VMEM)),
        compiler_params=pltpu.CompilerParams(vmem_limit_bytes=VMEM_LIMIT),
    )(x, p["w"], p["att_src"], p["att_dst"])

    def c0(shape):
        return pl.BlockSpec(shape, lambda i: (0,) * len(shape))

    in_specs = [
        c0((npad, HP)),                                   # g: all sources (bf16, resident)
        c0((1, npad)),                                    # a_src row
        pl.BlockSpec((tm, 1), lambda i: (i, 0)),          # a_dst target rows
        pl.BlockSpec((tm, HP), lambda i: (i, 0)),         # x target rows (GRU h_prev)
        pl.BlockSpec((tm, npad), lambda i: (i, 0)),       # adj target rows
        c0(p["bias"].shape),
        c0(p["gru_w_ih"].shape), c0(p["gru_w_hh"].shape),
        c0(p["gru_b_ih"].shape), c0(p["gru_b_hh"].shape),
    ]
    return pl.pallas_call(
        atom_attn_kernel,
        out_shape=jax.ShapeDtypeStruct((npad, HP), jnp.float32),
        grid=(npad // tm,),
        in_specs=in_specs,
        out_specs=pl.BlockSpec((tm, HP), lambda i: (i, 0)),
        compiler_params=pltpu.CompilerParams(
            dimension_semantics=("parallel",),
            vmem_limit_bytes=VMEM_LIMIT),
    )(g, a_src, a_dst, x, adj,
      p["bias"], p["gru_w_ih"], p["gru_w_hh"], p["gru_b_ih"], p["gru_b_hh"])


def mol_readout(x, pool_mask, p, num_timesteps):
    b = pool_mask.shape[0]
    out_dim = p["w_lin2"].shape[1]
    kernel = functools.partial(mol_readout_kernel, num_timesteps=num_timesteps)
    return pl.pallas_call(
        kernel,
        out_shape=jax.ShapeDtypeStruct((b, out_dim), jnp.float32),
        in_specs=[pl.BlockSpec(memory_space=_VMEM)] * 12,
        out_specs=pl.BlockSpec(memory_space=_VMEM),
        compiler_params=pltpu.CompilerParams(vmem_limit_bytes=VMEM_LIMIT),
    )(x, pool_mask, p["w_mol"], p["att_src"], p["att_dst"], p["bias_mol"],
      p["gru_w_ih"], p["gru_w_hh"], p["gru_b_ih"], p["gru_b_hh"],
      p["w_lin2"], p["b_lin2"])


def attentive_fp_forward(x0, adj, ea3, pool_mask, params, num_timesteps, tiles):
    npad, tm_gate, nc, tm_atom = tiles
    x = gate_layer(x0, adj, ea3, params["gate"], npad, tm_gate, nc)
    for lp in params["atom"]:
        x = atom_layer(x, adj, lp, npad, tm_atom)
    out = mol_readout(x, pool_mask, params["mol"], num_timesteps)
    return jnp.squeeze(out, axis=-1)                      # torch .squeeze(-1)


# ---------------------------- params & graph prep --------------------------- #

def _pad2(a, rows, cols):
    out = jnp.zeros((rows, cols), jnp.float32)
    return out.at[:a.shape[0], :a.shape[1]].set(a)


def init_params(key, input_dim, hidden_dim, output_dim, num_layers, edge_dim):
    # NOTE: all padded weight/bias rows/columns are exactly zero -- this keeps
    # padded lanes identically zero through GRU / attention (do not change).
    h = hidden_dim
    keys = iter(jax.random.split(key, 128))

    def nrm(shape, scale=0.2):
        return scale * jax.random.normal(next(keys), shape, dtype=jnp.float32)

    def gru():
        wih = jnp.concatenate([_pad2(nrm((h, h)), HP, HP) for _ in range(3)], 1)
        whh = jnp.concatenate([_pad2(nrm((h, h)), HP, HP) for _ in range(3)], 1)
        bih = jnp.concatenate([_pad2(nrm((1, h)), 1, HP) for _ in range(3)], 1)
        bhh = jnp.concatenate([_pad2(nrm((1, h)), 1, HP) for _ in range(3)], 1)
        return dict(gru_w_ih=wih.astype(jnp.bfloat16),
                    gru_w_hh=whh.astype(jnp.bfloat16),
                    gru_b_ih=bih, gru_b_hh=bhh)

    gate = dict(
        w_lin1=_pad2(nrm((input_dim, h)), input_dim, HP),
        b_lin1=_pad2(nrm((1, h)), 1, HP),
        # [W1x | W2] fused into one 256-wide weight (one MXU pass on v6e/v7x).
        w12=jnp.concatenate([_pad2(nrm((h, h)), HP, HP),
                             _pad2(nrm((h, h)), HP, HP)], axis=1).astype(jnp.bfloat16),
        w1e=_pad2(nrm((edge_dim, h)), EP, HP).astype(jnp.bfloat16),
        att_l=_pad2(nrm((1, h)), 1, HP),
        att_r=_pad2(nrm((1, h)), 1, HP),
        bias=_pad2(nrm((1, h)), 1, HP),
        **gru())

    atom = []
    for _ in range(num_layers - 1):
        atom.append(dict(
            w=_pad2(nrm((h, h)), HP, HP).astype(jnp.bfloat16),
            att_src=_pad2(nrm((1, h)), 1, HP),
            att_dst=_pad2(nrm((1, h)), 1, HP),
            bias=_pad2(nrm((1, h)), 1, HP),
            **gru()))

    mol = dict(
        w_mol=_pad2(nrm((h, h)), HP, HP).astype(jnp.bfloat16),
        att_src=_pad2(nrm((1, h)), 1, HP),
        att_dst=_pad2(nrm((1, h)), 1, HP),
        bias_mol=_pad2(nrm((1, h)), 1, HP),
        w_lin2=_pad2(nrm((h, output_dim)), HP, output_dim),
        b_lin2=nrm((1, output_dim)),
        **gru())

    return dict(gate=gate, atom=atom, mol=mol)


def build_dense_graph(edge_index, edge_attr, npad):
    """Densify the edge list: adj[target, source] and ea[target, source, EP].
    AttentiveFP's convs use add_self_loops=False, so no self loops are added."""
    src, dst = edge_index[0], edge_index[1]
    e_dim = edge_attr.shape[1]
    adj = jnp.zeros((npad, npad), jnp.float32).at[dst, src].set(1.0)
    ea_pad = jnp.zeros((edge_attr.shape[0], EP), jnp.float32).at[:, :e_dim].set(edge_attr)
    ea = jnp.zeros((npad, npad, EP), jnp.float32).at[dst, src].set(ea_pad)
    return adj, ea.astype(jnp.bfloat16)


# ------------------------------------ main ----------------------------------- #

if __name__ == "__main__":
    key = jax.random.PRNGKey(0)

    # small synthetic "Data" batch: 2 graphs x 8 nodes
    num_graphs = 2
    nodes_per_graph = 8
    num_nodes = num_graphs * nodes_per_graph
    input_dim, hidden_dim, output_dim = 8, 32, 1
    num_timesteps, num_layers, edge_dim = 8, 2, 14
    edges_per_graph = 12

    k_x, k_src, k_dlt, k_ea, k_p = jax.random.split(key, 5)
    x = jax.random.normal(k_x, (num_nodes, input_dim), dtype=jnp.float32)

    src_l = jax.random.randint(k_src, (num_graphs, edges_per_graph), 0, nodes_per_graph)
    delta = jax.random.randint(k_dlt, (num_graphs, edges_per_graph), 1, nodes_per_graph)
    dst_l = (src_l + delta) % nodes_per_graph
    offs = (jnp.arange(num_graphs) * nodes_per_graph)[:, None]
    edge_index = jnp.stack([(src_l + offs).reshape(-1),
                            (dst_l + offs).reshape(-1)], axis=0)     # [2, E]
    edge_attr = jax.random.normal(k_ea, (edge_index.shape[1], edge_dim),
                                  dtype=jnp.float32)
    batch = jnp.repeat(jnp.arange(num_graphs), nodes_per_graph)      # [N]

    tiles = _grid_sizes(num_nodes)
    npad = tiles[0]

    # zero-padded nodes are isolated (no edges, not pooled) -> they never feed
    # real nodes or graph embeddings.
    x0 = jnp.zeros((npad, input_dim), jnp.float32).at[:num_nodes].set(x)
    batch_p = jnp.full((npad,), -1, jnp.int32).at[:num_nodes].set(batch)
    pool_mask = (batch_p[None, :] == jnp.arange(num_graphs)[:, None]).astype(jnp.float32)
    adj, ea3 = build_dense_graph(edge_index, edge_attr, npad)

    params = init_params(k_p, input_dim, hidden_dim, output_dim, num_layers, edge_dim)

    out = attentive_fp_forward(x0, adj, ea3, pool_mask, params, num_timesteps, tiles)
    out = jax.block_until_ready(out)
    assert out.shape == (num_graphs,), out.shape
    assert bool(jnp.all(jnp.isfinite(out)))
    print("KERNEL_OK")
</pallas_src>

<mosaic_0001>
module attributes {stable_mosaic.version = 11 : i64} {
  func.func @gate_proj_kernel(%arg0: memref<16x8xf32, #tpu.memory_space<vmem>>, %arg1: memref<8x128xf32, #tpu.memory_space<vmem>>, %arg2: memref<1x128xf32, #tpu.memory_space<vmem>>, %arg3: memref<128x256xbf16, #tpu.memory_space<vmem>>, %arg4: memref<16x128xf32, #tpu.memory_space<vmem>>, %arg5: memref<16x256xbf16, #tpu.memory_space<vmem>>) attributes {dimension_semantics = [], scalar_prefetch = 0 : i64, scratch_operands = 0 : i64, tpu.core_type = #tpu.core_type<tc>} {
    %c0 = arith.constant 0 : index
    %c0_0 = arith.constant 0 : index
    %0 = vector.load %arg0[%c0, %c0_0] : memref<16x8xf32, #tpu.memory_space<vmem>>, vector<16x8xf32>
    %c0_1 = arith.constant 0 : index
    %c0_2 = arith.constant 0 : index
    %1 = vector.load %arg1[%c0_1, %c0_2] : memref<8x128xf32, #tpu.memory_space<vmem>>, vector<8x128xf32>
    %cst = arith.constant dense<0.000000e+00> : vector<16x128xf32>
    %2 = tpu.matmul %0, %1, %cst {dimension_numbers = #tpu.dot_dimension_numbers<[1], [0], [0], [1], [0, 0, 1, 1], [], []>} : vector<16x8xf32>, vector<8x128xf32>, vector<16x128xf32> -> vector<16x128xf32>
    %c0_3 = arith.constant 0 : index
    %c0_4 = arith.constant 0 : index
    %3 = vector.load %arg2[%c0_3, %c0_4] : memref<1x128xf32, #tpu.memory_space<vmem>>, vector<1x128xf32>
    %4 = vector.broadcast %3 : vector<1x128xf32> to vector<16x128xf32>
    %5 = arith.addf %2, %4 : vector<16x128xf32>
    %cst_5 = arith.constant 0.000000e+00 : f32
    %6 = vector.broadcast %cst_5 : f32 to vector<16x128xf32>
    %7 = arith.cmpf ogt, %5, %6 : vector<16x128xf32>
    %cst_6 = arith.constant 0.00999999977 : f32
    %8 = vector.broadcast %cst_6 : f32 to vector<16x128xf32>
    %9 = arith.mulf %8, %5 : vector<16x128xf32>
    %10 = arith.select %7, %5, %9 : vector<16x128xi1>, vector<16x128xf32>
    %c0_7 = arith.constant 0 : index
    %c0_8 = arith.constant 0 : index
    %11 = vector.load %arg4[%c0_7, %c0_8] : memref<16x128xf32, #tpu.memory_space<vmem>>, vector<16x128xf32>
    tpu.vector_store %arg4[%c0_7, %c0_8], %10 {strides = array<i32>} : memref<16x128xf32, #tpu.memory_space<vmem>>, vector<16x128xf32>,
    %12 = arith.truncf %10 : vector<16x128xf32> to vector<16x128xbf16>
    %c0_9 = arith.constant 0 : index
    %c0_10 = arith.constant 0 : index
    %13 = vector.load %arg3[%c0_9, %c0_10] : memref<128x256xbf16, #tpu.memory_space<vmem>>, vector<128x256xbf16>
    %cst_11 = arith.constant dense<0.000000e+00> : vector<16x256xf32>
    %14 = tpu.matmul %12, %13, %cst_11 {dimension_numbers = #tpu.dot_dimension_numbers<[1], [0], [0], [1], [0, 0, 1, 1], [], []>} : vector<16x128xbf16>, vector<128x256xbf16>, vector<16x256xf32> -> vector<16x256xf32>
    %15 = arith.truncf %14 : vector<16x256xf32> to vector<16x256xbf16>
    %c0_12 = arith.constant 0 : index
    %c0_13 = arith.constant 0 : index
    %16 = vector.load %arg5[%c0_12, %c0_13] : memref<16x256xbf16, #tpu.memory_space<vmem>>, vector<16x256xbf16>
    tpu.vector_store %arg5[%c0_12, %c0_13], %15 {strides = array<i32>} : memref<16x256xbf16, #tpu.memory_space<vmem>>, vector<16x256xbf16>,
    return
  }
}

</mosaic_0001>

<bundles_post_ra>
// kernel: tpu_custom_call.1
= control target key start
LH: loop header
LB: loop body
LE: loop exit
PB: predicated region body
PF: predicated region fallthrough
CT: control target
= control target key end

     0   :  { %11 = vsyncpa [#allocation3], 0  ;;  %s549_s0 = inlined_call_operand.vmem [shape: f32[16,8], index: 0, kind: input, shape index: {}]   ;;  %s550_s1 = inlined_call_operand.vmem [shape: f32[8,128], index: 1, kind: input, shape index: {}]   ;;  %s551_s2 = inlined_call_operand.vmem [shape: f32[1,128], index: 2, kind: input, shape index: {}]   ;;  %s552_s3 = inlined_call_operand.hbm [shape: bf16[128,256], index: 3, kind: input, shape index: {}]   ;;  %s553_s4 = inlined_call_operand.hbm [shape: f32[16,128], index: 4, kind: output, shape index: {0}]   ;;  %s554_s5 = inlined_call_operand.hbm [shape: bf16[16,256], index: 5, kind: output, shape index: {1}]  }
   0x1   :  { %12 = vsyncpa [#allocation4], 0 }
   0x2   :  { %13 = vsyncpa [#allocation7], 0  ;;  %s456_s18 = smov [#allocation2]   ;;  %s384_s22 = scalar_lea.hbm %s552_s3, 2048 }
   0x3   :  { %s25_s19 = sshll.u32 %s456_s18, 4  ;;  %p385_p0 = scmp.ne.s32.totalorder %s552_s3, %s384_s22  ;;  %s26_s19 = int_to_ptr.vmem [resolvable:$true] %s25_s19 }
   0x4   :  { %p388_p1 = scmp.lt.u32.totalorder %s384_s22, %s552_s3 }
   0x6   :  { %p390_p2 = pnand %p388_p1, %p385_p0 }
   0x8   :  { %393 = shalt.err (!%p390_p2)
}
   0x9   :  { %s394_s27 = scalar_lea.vmem %s26_s19, 2048  ;;  %p399_p4 = scmp.lt.s32.totalorder %s26_s19, %s26_s19 }
   0xa   :  { %p395_p3 = scmp.ne.s32.totalorder %s26_s19, %s394_s27  ;;  %p400_p5 = scmp.lt.s32.totalorder %s394_s27, %s394_s27 }
   0xc   :  { %p401_p6 = por %p400_p5, %p399_p4 }
   0xe   :  { %p402_p7 = pnand %p401_p6, %p395_p3 }
  0x10   :  { %405 = shalt.err (!%p402_p7)
}
  0x11   :  { %s457_s28 = smov 128   ;;  %s458_s29 = smov 8  }
  0x12   :  { %31 = dma.hbm_to_vmem [thread:$0]  %s552_s3, 2048, %s26_s19, [#allocation3], %s457_s28, %s457_s28, %s458_s29  }
  0x13   :  { %450 = dma.done.wait [#allocation3], 2048  }
  0x14   :  { %451 = vsyncadd [#allocation3], 4294965248  ;;  %vm46_vm0 = vcmask 64512   ;;  %v38_v0 = vld [vmem:[%s550_s1] sm:$0xff]  ;;  %v37_v2 = vld [vmem:[%s549_s0 + $0x8] sm:$0xff]  ;;  %v459_v19 = vmov 0  }
  0x15   :  { %v36_v1 = vld [vmem:[%s549_s0] sm:$0xff]  ;;  %349 = vmatprep.subr.mxu0 %v38_v0  ;;  %v360_v3 = vld [vmem:[#allocation2 + $0x4] ss:$8 sps:$4 sm:$0xff]   ;;  %v362_v4 = vld [vmem:[#allocation2] ss:$8 sps:$4 sm:$0xff]   ;;  %265 = vmatprep.mubr.bf16.mxu1 %v459_v19  ;;  %s460_s3 = smov [#allocation5]  }
  0x16   :  { %351 = vmatprep.mubr.msk.f32.mxu0 %vm46_vm0, %v36_v1  ;;  %350 = vmatpush3.msra.mxu0 %v38_v0  ;;  %v363_v5 = vld [vmem:[#allocation2 + $0x14] ss:$8 sps:$4 sm:$0xff]   ;;  %v365_v6 = vld [vmem:[#allocation2 + $0x10] ss:$8 sps:$4 sm:$0xff]   ;;  %v366_v7 = vld [vmem:[#allocation2 + $0x24] ss:$8 sps:$4 sm:$0xff]  }
  0x17   :  { %352 = vmatmul.mubr.msk.f32.vlgmr.msra.gmra.mrb[0].mxu0 %vm46_vm0, %v37_v2  ;;  %233 = vmatprep.subr.bf16.mxu1 %v360_v3  ;;  %v368_v8 = vld [vmem:[#allocation2 + $0x20] ss:$8 sps:$4 sm:$0xff]   ;;  %v369_v9 = vld [vmem:[#allocation2 + $0x34] ss:$8 sps:$4 sm:$0xff]   ;;  %v371_v10 = vld [vmem:[#allocation2 + $0x30] ss:$8 sps:$4 sm:$0xff]  }
  0x18   :  { %234 = vmatpush1.bf16.msra.mxu1 %v362_v4  ;;  %v372_v11 = vld [vmem:[#allocation2 + $0x44] ss:$8 sps:$4 sm:$0xff]   ;;  %v374_v12 = vld [vmem:[#allocation2 + $0x40] ss:$8 sps:$4 sm:$0xff]   ;;  %v375_v13 = vld [vmem:[#allocation2 + $0x54] ss:$8 sps:$4 sm:$0xff]  }
  0x19   :  { %235 = vmatprep.subr.bf16.mxu1 %v363_v5  ;;  %v377_v14 = vld [vmem:[#allocation2 + $0x50] ss:$8 sps:$4 sm:$0xff]   ;;  %v378_v15 = vld [vmem:[#allocation2 + $0x64] ss:$8 sps:$4 sm:$0xff]   ;;  %v380_v16 = vld [vmem:[#allocation2 + $0x60] ss:$8 sps:$4 sm:$0xff]  }
  0x1a   :  { %v381_v17 = vld [vmem:[#allocation2 + $0x74] ss:$8 sps:$4 sm:$0xff]   ;;  %v383_v18 = vld [vmem:[#allocation2 + $0x70] ss:$8 sps:$4 sm:$0xff]   ;;  %s295_s13 = sshll.u32 %s460_s3, 4  ;;  %s296_s13 = int_to_ptr.vmem [resolvable:$true] %s295_s13 }
  0x1b   :  { %v323_v20 = vld [vmem:[%s551_s2] ss:$0 sm:$0xff]  ;;  %s406_s14 = scalar_lea.vmem %s296_s13, 256  ;;  %p411_p9 = scmp.lt.s32.totalorder %s296_s13, %s296_s13 }
  0x1c   :  { %236 = vmatpush1.bf16.msra.mxu1 %v365_v6  ;;  %p407_p8 = scmp.ne.s32.totalorder %s296_s13, %s406_s14  ;;  %p412_p10 = scmp.lt.s32.totalorder %s406_s14, %s406_s14 }
  0x1d   :  { %237 = vmatprep.subr.bf16.mxu1 %v366_v7 }
  0x1e   :  { %p413_p11 = por %p412_p10, %p411_p9 }
  0x20   :  { %238 = vmatpush1.bf16.msra.mxu1 %v368_v8  ;;  %p414_p12 = pnand %p413_p11, %p407_p8 }
  0x21   :  { %239 = vmatprep.subr.bf16.mxu1 %v369_v9 }
  0x24   :  { %240 = vmatpush1.bf16.msra.mxu1 %v371_v10 }
  0x25   :  { %241 = vmatprep.subr.bf16.mxu1 %v372_v11 }
  0x28   :  { %242 = vmatpush1.bf16.msra.mxu1 %v374_v12 }
  0x29   :  { %243 = vmatprep.subr.bf16.mxu1 %v375_v13 }
  0x2c   :  { %244 = vmatpush1.bf16.msra.mxu1 %v377_v14 }
  0x2d   :  { %245 = vmatprep.subr.bf16.mxu1 %v378_v15 }
  0x30   :  { %246 = vmatpush1.bf16.msra.mxu1 %v380_v16 }
  0x31   :  { %247 = vmatprep.subr.bf16.mxu1 %v381_v17 }
  0x34   :  { %248 = vmatpush1.bf16.msra.mxu1 %v383_v18 }
  0xea   :  { %v353_v21 = vpop.f32.mrb[0].mxu0 }
  0xeb   :  { %v125_v22 = vadd.f32 %v353_v21, %v323_v20  ;;  %v119_v23 = vpop.f32.mrb[1].mxu0 }
  0xec   :  { %v120_v24 = vadd.f32 %v323_v20, %v119_v23 }
  0xed   :  { %vm129_vm1 = vcmp.gt.f32.partialorder %v125_v22, 0.0  ;;  %v131_v25 = vmul.f32 0.01, %v125_v22 }
  0xee   :  { %vm128_vm2 = vcmp.gt.f32.partialorder %v120_v24, 0.0  ;;  %v130_v26 = vmul.f32 0.01, %v120_v24 }
  0xef   :  { %v133_v27 = vsel %vm129_vm1, %v125_v22, %v131_v25 }
  0xf0   :  { %v132_v28 = vsel %vm128_vm2, %v120_v24, %v130_v26  ;;  %135 = vst [vmem:[#allocation5 + $0x8] sm:$0xff] %v133_v27 }
  0xf1   :  { %v136_v29 = vpack.c.bf16 %v133_v27, %v132_v28  ;;  %134 = vst [vmem:[#allocation5] sm:$0xff] %v132_v28 }
  0xf3   :  { %266 = vmatmul.mubr.bf16.vlgmr.msra.gmra.mrb[0].mxu1 %v136_v29 }
  0xf4   :  { %417 = shalt.err (!%p414_p12)
}
  0xf5   :  { %s418_s16 = scalar_lea.hbm %s553_s4, 256 }
  0xf6   :  { %p419_p13 = scmp.ne.s32.totalorder %s553_s4, %s418_s16  ;;  %p422_p0 = scmp.lt.u32.totalorder %s418_s16, %s553_s4 }
  0xf8   :  { %p424_p1 = pnand %p422_p0, %p419_p13 }
  0xfa   :  { %427 = shalt.err (!%p424_p1)
}
  0xfb   :  { %301 = dma.vmem_to_hbm [thread:$0]  %s296_s13, 256, %s553_s4, [#allocation4], %s457_s28, %s457_s28, %s458_s29  }
  0xfc   :  { %s461_s23 = smov [#allocation6]  }
  0xfd   :  { %s307_s24 = sshll.u32 %s461_s23, 4  ;;  %s308_s24 = int_to_ptr.vmem [resolvable:$true] %s307_s24 }
  0xfe   :  { %s428_s25 = scalar_lea.vmem %s308_s24, 256  ;;  %p433_p3 = scmp.lt.s32.totalorder %s308_s24, %s308_s24 }
  0xff   :  { %p429_p2 = scmp.ne.s32.totalorder %s308_s24, %s428_s25  ;;  %p434_p4 = scmp.lt.s32.totalorder %s428_s25, %s428_s25 }
 0x101   :  { %p435_p5 = por %p434_p4, %p433_p3 }
 0x103   :  { %p436_p6 = pnand %p435_p5, %p429_p2 }
 0x1c6   :  { %v267_v30 = vpop.f32.mrb[0].mxu1 }
 0x1c7   :  { %v269_v31 = vpop.f32.mrb[1].mxu1 }
 0x1c8   :  { %v344_v32 = vpack.c.bf16 %v269_v31, %v267_v30  ;;  %v271_v33 = vpop.f32.mrb[2].mxu1 }
 0x1c9   :  { %v273_v34 = vpop.f32.mrb[3].mxu1 }
 0x1ca   :  { %288 = vst [vmem:[#allocation6] sm:$0xff] %v344_v32  ;;  %v345_v35 = vpack.c.bf16 %v273_v34, %v271_v33 }
 0x1cc   :  { %289 = vst [vmem:[#allocation6 + $0x8] sm:$0xff] %v345_v35 }
 0x1cd   :  { %439 = shalt.err (!%p436_p6)
}
 0x1ce   :  { %s440_s27 = scalar_lea.hbm %s554_s5, 256 }
 0x1cf   :  { %p441_p7 = scmp.ne.s32.totalorder %s554_s5, %s440_s27  ;;  %p444_p8 = scmp.lt.u32.totalorder %s440_s27, %s554_s5 }
 0x1d1   :  { %p446_p9 = pnand %p444_p8, %p441_p7 }
 0x1d3   :  { %449 = shalt.err (!%p446_p9)
}
 0x1d4   :  { %313 = dma.vmem_to_hbm [thread:$0]  %s308_s24, 256, %s554_s5, [#allocation7], %s457_s28, %s457_s28, %s458_s29  }
 0x1d5   :  { %452 = dma.done.wait [#allocation4], 256  }
 0x1d6   :  { %453 = vsyncadd [#allocation4], 4294967040 }
 0x1d7   :  { %454 = dma.done.wait [#allocation7], 256  }
 0x1d8   :  { %455 = vsyncadd [#allocation7], 4294967040 }
 0x1d9   :  { %320 = vsyncpa [#allocation3], 1 }
 0x1da   :  { %321 = vsyncpa [#allocation4], 1 }
 0x1db   :  { %322 = vsyncpa [#allocation7], 1 }

</bundles_post_ra>
